<compile_context>
chip_gen: v6e
topology: v6e:2x2x1
jax: 0.10.0
libtpu: 0.0.40
codegen_flags: <defaults>
</compile_context>

<pallas_src>
import jax
import jax.numpy as jnp
from jax.experimental import pallas as pl
from jax.experimental.pallas import tpu as pltpu


def _pos_add_kernel(x_ref, pos_ref, o_ref):
    # x_ref:   (TS, D) block of the current batch element (batch dim squeezed)
    # pos_ref: (TS, D) positional-embedding row block (resident across batch)
    # o_ref:   (TS, D)
    o_ref[...] = (x_ref[...] + pos_ref[...]).astype(o_ref.dtype)


def _choose_seq_tile(seq_len, dim, itemsize, target_block_bytes):
    """Largest multiple-of-8 row tile whose block stays under target bytes."""
    rows = target_block_bytes // max(1, dim * itemsize)
    rows = max(8, (int(rows) // 8) * 8)
    return seq_len if rows >= seq_len else rows


def learned_pos_embedding(x, embedding_table, seq_len, position_id=None,
                          *, target_block_bytes=2 * 1024 * 1024):
    """x: (B, S, D); embedding_table: (max_num_embedding, D)."""
    B, S, D = x.shape
    if S != seq_len:
        raise ValueError(f"x seq dim {S} != seq_len {seq_len}")
    n_emb, d_emb = embedding_table.shape
    if d_emb != D:
        raise ValueError(f"embedding dim mismatch: table {d_emb} vs x {D}")

    # PyTorch-style promotion: add in the promoted dtype, output that dtype.
    out_dtype = jnp.result_type(x.dtype, embedding_table.dtype)

    itemsize = max(jnp.dtype(x.dtype).itemsize,
                   jnp.dtype(embedding_table.dtype).itemsize)
    TS = _choose_seq_tile(S, D, itemsize, target_block_bytes)
    grid_s = pl.cdiv(S, TS)

    if position_id is None:
        # arange(S) IDs == first S rows of the table; let the index_map pick the
        # row block directly from the full table (no wrapper-side slice copy),
        # unless the (8, .) block-shape constraint forces a slice.
        if TS % 8 == 0 or TS == n_emb:
            pos = embedding_table
        else:
            pos = embedding_table[:S]
    else:
        position_id = jnp.asarray(position_id)
        if position_id.shape not in ((S,), (1, S)):
            raise ValueError(
                f"position_id must have shape ({S},) or (1, {S}); "
                f"got {position_id.shape}")
        pos = jnp.take(embedding_table, position_id.reshape(S), axis=0)
        # TODO(synk): for large S*D with per-call position_id, fuse this gather
        # into the kernel via PrefetchScalarGridSpec(num_scalar_prefetch=1) and
        # a pl.Element row index_map to avoid the extra (S, D) HBM round trip.

    return pl.pallas_call(
        _pos_add_kernel,
        out_shape=jax.ShapeDtypeStruct((B, S, D), out_dtype),
        grid_spec=pltpu.PrefetchScalarGridSpec(
            num_scalar_prefetch=0,
            # seq tile OUTER, batch INNER: pos block index only changes on the
            # outer axis -> the pos slab is fetched once per seq tile and reused
            # for every batch element.
            grid=(grid_s, B),
            in_specs=[
                pl.BlockSpec((pl.Squeezed(), TS, D), lambda s, b: (b, s, 0)),
                pl.BlockSpec((TS, D), lambda s, b: (s, 0)),
            ],
            out_specs=pl.BlockSpec((pl.Squeezed(), TS, D),
                                   lambda s, b: (b, s, 0)),
        ),
        compiler_params=pltpu.CompilerParams(
            dimension_semantics=("parallel", "parallel")),
    )(x, pos)


if __name__ == "__main__":
    # Small but lane-dense demo shapes (embedding_dim is a multiple of 128 so
    # stores are unmasked, as they would be for real SETR hidden sizes).
    embedding_dim = 256
    max_num_embedding = 32
    seq_len = 16
    batch = 2

    key = jax.random.PRNGKey(0)
    k_x, k_emb, k_ids = jax.random.split(key, 3)

    # nn.Embedding default init is N(0, 1).
    embedding_table = jax.random.normal(
        k_emb, (max_num_embedding, embedding_dim), dtype=jnp.float32)
    x = jax.random.normal(
        k_x, (batch, seq_len, embedding_dim), dtype=jnp.float32)

    # Default (arange) positional-ID path.
    out = jax.block_until_ready(
        learned_pos_embedding(x, embedding_table, seq_len))
    ref = x + embedding_table[:seq_len][None, :, :]
    assert out.shape == (batch, seq_len, embedding_dim)
    assert out.dtype == ref.dtype
    assert jnp.allclose(out, ref, atol=1e-6, rtol=1e-6)

    # Explicit position_id path, shape (1, S) like the PyTorch buffer slice.
    pos_ids = jax.random.randint(k_ids, (1, seq_len), 0, max_num_embedding)
    out2 = jax.block_until_ready(
        learned_pos_embedding(x, embedding_table, seq_len, position_id=pos_ids))
    ref2 = x + embedding_table[pos_ids.reshape(-1)][None, :, :]
    assert jnp.allclose(out2, ref2, atol=1e-6, rtol=1e-6)

    print("KERNEL_OK")
</pallas_src>

<mosaic_0001>
module attributes {stable_mosaic.version = 11 : i64} {
  func.func @_pos_add_kernel(%arg0: i32, %arg1: i32, %arg2: memref<1x16x256xf32, #tpu.memory_space<vmem>>, %arg3: memref<16x256xf32, #tpu.memory_space<vmem>>, %arg4: memref<1x16x256xf32, #tpu.memory_space<vmem>>) attributes {dimension_semantics = [#tpu.dimension_semantics<parallel>, #tpu.dimension_semantics<parallel>], iteration_bounds = array<i64: 1, 2>, scalar_prefetch = 0 : i64, scratch_operands = 0 : i64, tpu.core_type = #tpu.core_type<tc>, window_params = [{transform_indices = @transform_0, window_bounds = array<i64: 1, 16, 256>}, {transform_indices = @transform_1, window_bounds = array<i64: 16, 256>}, {transform_indices = @transform_2, window_bounds = array<i64: 1, 16, 256>}]} {
    %c0 = arith.constant 0 : index
    %c0_0 = arith.constant 0 : index
    %c0_1 = arith.constant 0 : index
    %0 = vector.load %arg2[%c0, %c0_0, %c0_1] : memref<1x16x256xf32, #tpu.memory_space<vmem>>, vector<1x16x256xf32>
    %1 = vector.shape_cast %0 : vector<1x16x256xf32> to vector<16x256xf32>
    %c0_2 = arith.constant 0 : index
    %c0_3 = arith.constant 0 : index
    %2 = vector.load %arg3[%c0_2, %c0_3] : memref<16x256xf32, #tpu.memory_space<vmem>>, vector<16x256xf32>
    %3 = arith.addf %1, %2 : vector<16x256xf32>
    %c0_4 = arith.constant 0 : index
    %c0_5 = arith.constant 0 : index
    %c0_6 = arith.constant 0 : index
    %4 = vector.load %arg4[%c0_4, %c0_5, %c0_6] : memref<1x16x256xf32, #tpu.memory_space<vmem>>, vector<1x16x256xf32>
    %5 = vector.shape_cast %4 : vector<1x16x256xf32> to vector<16x256xf32>
    %6 = vector.shape_cast %3 : vector<16x256xf32> to vector<1x16x256xf32>
    tpu.vector_store %arg4[%c0_4, %c0_5, %c0_6], %6 {strides = array<i32>} : memref<1x16x256xf32, #tpu.memory_space<vmem>>, vector<1x16x256xf32>,
    return
  }
  func.func @transform_0(%arg0: i32, %arg1: i32) -> (i32, i32, i32) {
    %c0_i32 = arith.constant 0 : i32
    %c0_i32_0 = arith.constant 0 : i32
    return %arg1, %arg0, %c0_i32 : i32, i32, i32
  }
  func.func @transform_1(%arg0: i32, %arg1: i32) -> (i32, i32) {
    %c0_i32 = arith.constant 0 : i32
    %c0_i32_0 = arith.constant 0 : i32
    return %arg0, %c0_i32 : i32, i32
  }
  func.func @transform_2(%arg0: i32, %arg1: i32) -> (i32, i32, i32) {
    %c0_i32 = arith.constant 0 : i32
    %c0_i32_0 = arith.constant 0 : i32
    return %arg1, %arg0, %c0_i32 : i32, i32, i32
  }
}

</mosaic_0001>

<bundles_post_ra>
// kernel: tpu_custom_call.1
= control target key start
LH: loop header
LB: loop body
LE: loop exit
PB: predicated region body
PF: predicated region fallthrough
CT: control target
= control target key end

     0   :  { %7 = vsyncpa [#allocation3], 0  ;;  %s785_s0 = inlined_call_operand.hbm [shape: f32[2,16,256], index: 0, kind: input, shape index: {}]   ;;  %s786_s1 = inlined_call_operand.hbm [shape: f32[32,256], index: 1, kind: input, shape index: {}]   ;;  %s787_s2 = inlined_call_operand.hbm [shape: f32[2,16,256], index: 2, kind: output, shape index: {}]  }
   0x1   :  { %9 = vsyncpa [#allocation3 + $0x1], 0 }
   0x2   :  { %10 = vsyncpa [#allocation6], 0 }
   0x3   :  { %11 = vsyncpa [#allocation4], 0 }
   0x4   :  { %13 = vsyncpa [#allocation4 + $0x1], 0  ;;  %s598_s9 = smov 0   ;;  %s600_s10 = smov 0  }
   0x5   :  { %s602_s11 = smov 0   ;;  %s604_s12 = smov 0  }
   0x6   :  { %s606_s13 = smov 0   ;;  %s608_s14 = smov 0  }
   0x7 LB: > { %s340_s15 = sadd.s32 4294967295, %s574_s14   ;;  %s341_s16 = sadd.s32 4294967294, %s574_s14   ;;  %s574_s14 = sphi %s608_s14, %s19_s14   ;;  %s570_s13 = sphi %s606_s13, %s807_s13   ;;  %s566_s12 = sphi %s604_s12, %s806_s12   ;;  %s562_s11 = sphi %s602_s11, %s805_s11   ;;  %s558_s10 = sphi %s600_s10, %s804_s10   ;;  %s554_s9 = sphi %s598_s9, %s803_s9  }
   0x8   : > { %p53_p0 = scmp.ne.s32.totalorder %s558_s10, %s554_s9  ;;  %p632_p1 = scmp.eq.s32.totalorder %s340_s15, 0 }
   0x9   : > { %p636_p2 = scmp.eq.s32.totalorder %s340_s15, 1  ;;  %p111_p3 = scmp.eq.s32.totalorder %s341_s16, 1 }
   0xa   : > { %p642_p4 = por %p632_p1, %p53_p0  ;;  %p342_p5 = scmp.ge.s32.totalorder %s574_s14, 1 }
   0xb   : > { %p647_p6 = por %p111_p3, %p53_p0  ;;  %p118_p7 = scmp.lt.s32.totalorder %s574_s14, 3 }
   0xc   : > { %s792_s19 = scalar_select %p642_p4, 1, 0 }
   0xd   : > { %s793_s20 = scalar_select %p647_p6, 1, 0 }
   0xe   : > { %p652_p8 = pnand %p342_p5, %p118_p7  ;;  %s576_s22 = smov [#allocation5]  }
   0xf   : > { %s134_s23 = sshll.u32 %s576_s22, 4  ;;  %s28_s25 = sadd.s32 1, %s570_s13  ;;  %s135_s23 = int_to_ptr.vmem [resolvable:$true] %s134_s23 }
  0x10   : > { %p367_p9 = pneg %p652_p8  ;;  %s447_s26 = scalar_lea.vmem %s135_s23, 512 }
  0x11   : > { %p448_p13 = scmp.ne.s32.totalorder %s135_s23, %s447_s26  ;;  %p455_p5 = scmp.lt.s32.totalorder %s135_s23, %s135_s23 }
  0x12   : > { %p661_p11 = pnand %p367_p9, %p632_p1  ;;  %p456_p7 = scmp.lt.s32.totalorder %s447_s26, %s447_s26 }
  0x14   : > { %p438_p12 = pneg %p661_p11  ;;  %p457_p6 = por %p456_p7, %p455_p5 }
  0x16   : > { %p450_p0 = pnand %p448_p13, %p438_p12 }
  0x18   : > { %p451_p3 = pneg %p450_p0 }
  0x1a   : > { %p458_p4 = pnand %p457_p6, %p451_p3 }
  0x1c   : > { %461 = shalt.err (!%p458_p4)
}
  0x1d   : > { %s789_s27 = smov 256   ;;  %s578_s28 = smov 16  }
  0x1e   : > { %370 = dma.hbm_to_vmem [thread:$0]  (!%p661_p11), %s786_s1, 512, %s135_s23, [#allocation6], %s789_s27, %s789_s27, %s578_s28  }
  0x1f   : > { %p29_p4 = scmp.ge.s32.totalorder %s28_s25, 2  ;;  %s40_s3 = sadd.s32 1, %s562_s11 }
  0x20   : > { %p47_p6 = scmp.ne.s32.totalorder %s562_s11, %s558_s10  ;;  %p48_p9 = scmp.eq.s32.totalorder %s574_s14, 0 }
  0x21   : > { %s809_s25 = smov (%p29_p4, %s28_s25), 0  ;;  %p380_p0 = scmp.lt.s32.totalorder %s574_s14, 2 }
  0x22   : > { %p682_p12 = por %p48_p9, %p47_p6  ;;  %p688_p13 = por %p636_p2, %p47_p6 }
  0x23   : > { %s35_s6 = ssub.s32 %s570_s13, %s809_s25  ;;  %s148_s7 = sand.u32 1, %s562_s11  }
  0x24   : > { %p38_p11 = scmp.eq.s32.totalorder %s35_s6, 0  ;;  %s345_s8 = sshll.u32 %s148_s7, 5 }
  0x25   : > { %s357_s16 = sshll.u32 %s570_s13, 9  ;;  %s152_s26 = scalar_lea.vmem [#allocation2], %s345_s8 }
  0x26   : > { %s697_s15 = scalar_select %p38_p11, %s562_s11, %s40_s3  }
  0x27   : > { %s161_s24 = scalar_lea.hbm %s785_s0, %s357_s16  ;;  %s162_s29 = sshll.u32 %s152_s26, 4  ;;  %s163_s29 = int_to_ptr.vmem [resolvable:$true] %s162_s29 }
  0x28   : > { %p705_p2 = pnand %p380_p0, %p682_p12  ;;  %s149_s30 = scalar_lea.sflag [#allocation3], %s148_s7 }
  0x29   : > { %s475_s6 = scalar_lea.vmem %s163_s29, 512  ;;  %s579_s3 = smov [#allocation2]  }
  0x2a   : > { %p464_p3 = pneg %p705_p2  ;;  %p476_p5 = scmp.ne.s32.totalorder %s163_s29, %s475_s6 }
  0x2b   : > { %s480_s27 = sshll.u32 %s579_s3, 4  ;;  %s481_s27 = int_to_ptr.vmem [resolvable:$false] %s480_s27 }
  0x2c   : > { %p478_p7 = pnand %p476_p5, %p464_p3  ;;  %s482_s16 = scalar_lea.vmem %s481_s27, 1024 }
  0x2d   : > { %p483_p6 = scmp.lt.s32.totalorder %s163_s29, %s481_s27  ;;  %p484_p9 = scmp.lt.s32.totalorder %s482_s16, %s475_s6 }
  0x2e   : > { %p479_p4 = pneg %p478_p7 }
  0x2f   : > { %p485_p11 = por %p484_p9, %p483_p6 }
  0x31   : > { %p486_p10 = pnand %p485_p11, %p479_p4 }
  0x33   : > { %489 = shalt.err (!%p486_p10)
}
  0x34   : > { %s799_s4 = smov 256   ;;  %174 = sbr.rel (%p652_p8) target bundleno = 85 (0x55), region = 28 }
  0x35   : > { %374 = dma.hbm_to_vmem [thread:$0]  (!%p705_p2), %s161_s24, 512, %s163_s29, %s149_s30, %s799_s4, %s799_s4, %s578_s28  }
  0x36   : > { %s719_s7 = sand.u32 (!%p652_p8), 1, %s558_s10   ;;  %p800_p12 = scmp.ne.s32.totalorder (!%p652_p8), %s792_s19, 0 }
  0x37   : > { %s349_s27 = sshll.u32 (!%p652_p8), %s719_s7, 5  ;;  %s177_s8 = scalar_lea.sflag (!%p652_p8), [#allocation3], %s719_s7 }
  0x38   : > { %s180_s22 = scalar_lea.vmem (!%p652_p8), [#allocation2], %s349_s27 }
  0x39   : > { %541 = dma.done.wait (%p800_p12), %s177_s8, 512  }
  0x3a   : > { %543 = vsyncadd (%p800_p12), %s177_s8, 4294966784 }
  0x3b   : > { %545 = dma.done.wait (%p632_p1), [#allocation6], 512  }
  0x3c   : > { %547 = vsyncadd (%p632_p1), [#allocation6], 4294966784  ;;  %s204_s21 = scalar_lea.vmem [#allocation7], %s349_s27  ;;  %s358_s23 = sshll.u32 %s566_s12, 9  ;;  %v208_v0 = vld [vmem:[%s180_s22] sm:$0xff]  ;;  %v209_v2 = vld [vmem:[%s180_s22 + $0x8] sm:$0xff] }
  0x3d   : > { %s241_s28 = sshll.u32 %s204_s21, 4  ;;  %v212_v1 = vld [vmem:[#allocation5] sm:$0xff]  ;;  %v213_v4 = vld [vmem:[#allocation5 + $0x8] sm:$0xff]  ;;  %v210_v5 = vld [vmem:[%s180_s22 + $0x10] sm:$0xff]  ;;  %s737_s12 = scalar_lea.hbm %s787_s2, %s358_s23  ;;  %s732_s28 = int_to_ptr.vmem [resolvable:$true] %s241_s28 }
  0x3e   : > { %v216_v3 = vadd.f32 %v212_v1, %v208_v0  ;;  %v214_v6 = vld [vmem:[#allocation5 + $0x10] sm:$0xff]  ;;  %v217_v7 = vadd.f32 %v213_v4, %v209_v2  ;;  %v211_v9 = vld [vmem:[%s180_s22 + $0x18] sm:$0xff]  ;;  %s225_s24 = scalar_lea.sflag [#allocation4], %s719_s7  ;;  %s490_s26 = scalar_lea.vmem %s732_s28, 512 }
  0x3f   : > { %v218_v8 = vadd.f32 %v214_v6, %v210_v5  ;;  %v215_v10 = vld [vmem:[#allocation5 + $0x18] sm:$0xff]  ;;  %p491_p1 = scmp.ne.s32.totalorder %s732_s28, %s490_s26  ;;  %s580_s29 = smov [#allocation7]  }
  0x40   : > { %220 = vst [vmem:[%s204_s21] sm:$0xff] %v216_v3  ;;  %v219_v11 = vadd.f32 %v215_v10, %v211_v9  ;;  %221 = vst [vmem:[%s204_s21 + $0x8] sm:$0xff] %v217_v7  ;;  %s494_s18 = sshll.u32 %s580_s29, 4  ;;  %s495_s18 = int_to_ptr.vmem [resolvable:$false] %s494_s18 }
  0x41   : > { %222 = vst [vmem:[%s204_s21 + $0x10] sm:$0xff] %v218_v8  ;;  %p492_p8 = pnand %p491_p1, %p688_p13  ;;  %s496_s30 = scalar_lea.vmem %s495_s18, 1024 }
  0x42   : > { %223 = vst [vmem:[%s204_s21 + $0x18] sm:$0xff] %v219_v11  ;;  %p497_p0 = scmp.lt.s32.totalorder %s732_s28, %s495_s18  ;;  %p498_p2 = scmp.lt.s32.totalorder %s496_s30, %s490_s26 }
  0x43   : > { %p493_p10 = pneg %p492_p8 }
  0x44   : > { %p499_p3 = por %p498_p2, %p497_p0 }
  0x46   : > { %p500_p5 = pnand %p499_p3, %p493_p10 }
  0x48   : > { %503 = shalt.err (!%p500_p5)
}
  0x49   : > { %s504_s6 = scalar_lea.hbm %s737_s12, 512  ;;  %s508_s4 = scalar_lea.hbm %s787_s2, 1024 }
  0x4a   : > { %p505_p7 = scmp.ne.s32.totalorder %s737_s12, %s504_s6  ;;  %p509_p9 = scmp.lt.s32.totalorder %s737_s12, %s787_s2 }
  0x4b   : > { %p510_p11 = scmp.lt.s32.totalorder %s508_s4, %s504_s6 }
  0x4c   : > { %p506_p4 = pnand %p505_p7, %p688_p13 }
  0x4d   : > { %p511_p12 = por %p510_p11, %p509_p9 }
  0x4e   : > { %p507_p6 = pneg %p506_p4 }
  0x50   : > { %p512_p1 = pnand %p511_p12, %p507_p6 }
  0x52   : > { %515 = shalt.err (!%p512_p1)
}
  0x53   : > { %s581_s22 = smov 256   ;;  %s582_s21 = smov 16  }
  0x54   : > { %365 = dma.vmem_to_hbm [thread:$0]  (%p688_p13), %s732_s28, 512, %s737_s12, %s225_s24, %s581_s22, %s581_s22, %s582_s21  }
  0x55 PF: > { %s256_s23 = sand.u32 1, %s554_s9   ;;  %p801_p8 = scmp.ne.s32.totalorder %s793_s20, 0 }
  0x56   : > { %p802_p10 = scmp.ge.s32.totalorder %s574_s14, 2  ;;  %s257_s17 = scalar_lea.sflag [#allocation4], %s256_s23 }
  0x58   : > { %p376_p0 = pnand %p802_p10, %p801_p8 }
  0x5a   : > { %p377_p2 = pneg %p376_p0 }
  0x5c   : > { %549 = dma.done.wait (%p377_p2), %s257_s17, 512  }
  0x5d   : > { %551 = vsyncadd (%p377_p2), %s257_s17, 4294966784  ;;  %s19_s14 = sadd.s32 1, %s574_s14   ;;  %s803_s9 = smov %s558_s10 }
  0x5e   : > { %p16_p3 = scmp.ge.s32.totalorder %s19_s14, 4   ;;  %s804_s10 = smov %s562_s11 }
  0x5f   : > { %s805_s11 = smov %s697_s15  ;;  %s806_s12 = smov %s570_s13 }
  0x60   : > { %s807_s13 = smov %s809_s25  ;;  %18 = sbr.rel (!%p16_p3) target bundleno = 7 (0x7), region = 78 }
  0x65   :  { %262 = vsyncpa [#allocation3], 1 }
  0x66   :  { %264 = vsyncpa [#allocation3 + $0x1], 1 }
  0x67   :  { %265 = vsyncpa [#allocation6], 1 }
  0x68   :  { %266 = vsyncpa [#allocation4], 1 }
  0x69   :  { %268 = vsyncpa [#allocation4 + $0x1], 1 }

</bundles_post_ra>
